<compile_context>
chip_gen: v7x
topology: tpu7x:2x2x1
jax: 0.10.0
libtpu: 0.0.40
codegen_flags: <defaults>
</compile_context>

<pallas_src>
import functools

import numpy as np
import jax
import jax.numpy as jnp
from jax.experimental import pallas as pl
from jax.experimental.pallas import tpu as pltpu


def _round_up(x, m):
    return (x + m - 1) // m * m


# ----------------------------------------------------------------------------
# Pallas kernel: fused matmul + BN affine + optional residual + optional ReLU
# ----------------------------------------------------------------------------
def _matmul_bn_kernel(*refs, relu, has_res):
    if has_res:
        a_ref, b_ref, s_ref, c_ref, r_ref, o_ref = refs
    else:
        a_ref, b_ref, s_ref, c_ref, o_ref = refs
        r_ref = None
    # bf16 x bf16 -> f32 accumulate on the MXU, f32 epilogue.
    y = jnp.dot(a_ref[...], b_ref[...], preferred_element_type=jnp.float32)
    y = y * s_ref[...] + c_ref[...]
    if r_ref is not None:
        y = y + r_ref[...].astype(jnp.float32)
    if relu:
        y = jnp.maximum(y, 0.0)
    o_ref[...] = y.astype(o_ref.dtype)


def matmul_bn(a, b_p, scale_p, bias_p, *, n, relu, residual=None,
              out_dtype=jnp.bfloat16):
    """a: (M, K) activations; b_p: (Kp, Np) pre-padded bf16 weights;
    scale_p/bias_p: (1, Np) f32 folded BN affine; residual: optional (M, n)."""
    M, K = a.shape
    Kp, Np = b_p.shape
    assert K <= Kp

    TM = min(128, _round_up(M, 16))          # bf16 sublane packing -> multiples of 16
    TN = min(256, Np)                        # fill 256-wide MXU where OC allows
    Mp = _round_up(M, TM)

    a_p = jnp.pad(a.astype(jnp.bfloat16), ((0, Mp - M), (0, Kp - K)))

    args = [a_p, b_p, scale_p, bias_p]
    in_specs = [
        pl.BlockSpec((TM, Kp), lambda i, j: (i, 0)),   # full-K tile: no k loop
        pl.BlockSpec((Kp, TN), lambda i, j: (0, j)),
        pl.BlockSpec((1, TN), lambda i, j: (0, j)),
        pl.BlockSpec((1, TN), lambda i, j: (0, j)),
    ]
    has_res = residual is not None
    if has_res:
        r_p = jnp.pad(residual.astype(jnp.bfloat16),
                      ((0, Mp - M), (0, Np - residual.shape[1])))
        args.append(r_p)
        in_specs.append(pl.BlockSpec((TM, TN), lambda i, j: (i, j)))

    out = pl.pallas_call(
        functools.partial(_matmul_bn_kernel, relu=relu, has_res=has_res),
        out_shape=jax.ShapeDtypeStruct((Mp, Np), out_dtype),
        grid_spec=pltpu.PrefetchScalarGridSpec(
            num_scalar_prefetch=0,
            grid=(Mp // TM, Np // TN),
            in_specs=in_specs,
            out_specs=pl.BlockSpec((TM, TN), lambda i, j: (i, j)),
        ),
        compiler_params=pltpu.CompilerParams(
            dimension_semantics=("parallel", "parallel")),
    )(*args)
    return out[:M, :n]


# ----------------------------------------------------------------------------
# Layers (im2col / pooling glue in plain JAX, hot path in the Pallas kernel)
# ----------------------------------------------------------------------------
def conv2d_bn(x, cp, *, relu, residual=None):
    """x: NHWC (bf16).  cp: prepared conv dict.  Returns NHWC bf16."""
    N, H, W, C = x.shape
    KH, KW, stride, pad, OC = cp['kh'], cp['kw'], cp['stride'], cp['pad'], cp['oc']
    OH = (H + 2 * pad - KH) // stride + 1
    OW = (W + 2 * pad - KW) // stride + 1
    xp = jnp.pad(x, ((0, 0), (pad, pad), (pad, pad), (0, 0)))
    cols = []
    for kh in range(KH):
        for kw in range(KW):
            cols.append(xp[:, kh:kh + stride * OH:stride, kw:kw + stride * OW:stride, :])
    patches = jnp.stack(cols, axis=3)                       # (N, OH, OW, KH*KW, C)
    A = patches.reshape(N * OH * OW, KH * KW * C)
    res2d = None if residual is None else residual.reshape(N * OH * OW, OC)
    y = matmul_bn(A, cp['B'], cp['scale'], cp['bias'], n=OC, relu=relu, residual=res2d)
    return y.reshape(N, OH, OW, OC)


def maxpool_3x3_s2_p1(x):
    # TODO(synk): trivial-compute op kept as plain-JAX chained maximum (per perf
    # review) instead of materializing a 9x stacked copy for a Pallas reduce.
    N, H, W, C = x.shape
    K, s, p = 3, 2, 1
    OH = (H + 2 * p - K) // s + 1
    OW = (W + 2 * p - K) // s + 1
    xp = jnp.pad(x, ((0, 0), (p, p), (p, p), (0, 0)), constant_values=float('-inf'))
    out = None
    for kh in range(K):
        for kw in range(K):
            sl = xp[:, kh:kh + s * OH:s, kw:kw + s * OW:s, :]
            out = sl if out is None else jnp.maximum(out, sl)
    return out


def basic_block(x, bp):
    if 'down' in bp:
        identity = conv2d_bn(x, bp['down'], relu=False)
    else:
        identity = x
    out = conv2d_bn(x, bp['conv1'], relu=True)
    # conv2 + BN2 + residual add + ReLU fused into one kernel epilogue.
    out = conv2d_bn(out, bp['conv2'], relu=True, residual=identity)
    return out


def resnet18_forward(prep, x_nchw):
    x = jnp.transpose(x_nchw, (0, 2, 3, 1)).astype(jnp.bfloat16)   # NCHW -> NHWC, bf16
    x = conv2d_bn(x, prep['conv1'], relu=True)
    x = maxpool_3x3_s2_p1(x)
    for blocks in prep['layers']:
        for bp in blocks:
            x = basic_block(x, bp)
    feat = jnp.mean(x.astype(jnp.float32), axis=(1, 2))            # adaptive avgpool + flatten
    fc = prep['fc']
    logits = matmul_bn(feat.astype(jnp.bfloat16), fc['B'], fc['scale'], fc['bias'],
                       n=fc['oc'], relu=False, out_dtype=jnp.float32)
    return logits


# ----------------------------------------------------------------------------
# Parameter initialization (PyTorch layout) + one-time preparation for the kernel
# ----------------------------------------------------------------------------
def _fold_bn(gamma, beta, mean, var, eps=1e-5):
    scale = gamma / jnp.sqrt(var + eps)
    return scale, beta - mean * scale


def init_params(key, num_classes=10):
    kit = iter(jax.random.split(key, 256))

    def conv(oc, ic, kh, kw):
        fan_in = ic * kh * kw
        return jax.random.normal(next(kit), (oc, ic, kh, kw), jnp.float32) / np.sqrt(fan_in)

    def bn(c):
        gamma = 1.0 + 0.1 * jax.random.normal(next(kit), (c,), jnp.float32)
        beta = 0.1 * jax.random.normal(next(kit), (c,), jnp.float32)
        mean = 0.1 * jax.random.normal(next(kit), (c,), jnp.float32)
        var = 1.0 + 0.1 * jax.random.uniform(next(kit), (c,), jnp.float32)
        return _fold_bn(gamma, beta, mean, var)

    p = {'conv1_w': conv(64, 3, 7, 7), 'bn1': bn(64), 'layers': []}
    layer_cfg = [(64, 64, 1), (128, 64, 2), (256, 128, 2), (512, 256, 2)]
    for oc, ic, stride in layer_cfg:
        b0 = {'conv1_w': conv(oc, ic, 3, 3), 'bn1': bn(oc),
              'conv2_w': conv(oc, oc, 3, 3), 'bn2': bn(oc), 'stride': stride}
        if stride != 1 or ic != oc:
            b0['down_w'] = conv(oc, ic, 1, 1)
            b0['down_bn'] = bn(oc)
        b1 = {'conv1_w': conv(oc, oc, 3, 3), 'bn1': bn(oc),
              'conv2_w': conv(oc, oc, 3, 3), 'bn2': bn(oc), 'stride': 1}
        p['layers'].append([b0, b1])
    p['fc_w'] = jax.random.normal(next(kit), (num_classes, 512), jnp.float32) / np.sqrt(512)
    p['fc_b'] = 0.01 * jax.random.normal(next(kit), (num_classes,), jnp.float32)
    return p


def _prep_conv(w, bn_sc_bias, stride, pad):
    """Transpose to (kh,kw,c,oc), reshape to (K,OC), pad to (Kp,Np) bf16 — once."""
    scale, bias = bn_sc_bias
    OC, IC, KH, KW = w.shape
    K = KH * KW * IC
    Kp, Np = _round_up(K, 128), _round_up(OC, 128)
    B = jnp.transpose(w, (2, 3, 1, 0)).reshape(K, OC).astype(jnp.bfloat16)
    return {
        'B': jnp.pad(B, ((0, Kp - K), (0, Np - OC))),
        'scale': jnp.pad(scale.reshape(1, OC).astype(jnp.float32), ((0, 0), (0, Np - OC))),
        'bias': jnp.pad(bias.reshape(1, OC).astype(jnp.float32), ((0, 0), (0, Np - OC))),
        'kh': KH, 'kw': KW, 'stride': stride, 'pad': pad, 'oc': OC,
    }


def prepare_params(params):
    prep = {'conv1': _prep_conv(params['conv1_w'], params['bn1'], 2, 3), 'layers': []}
    for blocks in params['layers']:
        blocks_p = []
        for bp in blocks:
            stride = bp['stride']
            pb = {'conv1': _prep_conv(bp['conv1_w'], bp['bn1'], stride, 1),
                  'conv2': _prep_conv(bp['conv2_w'], bp['bn2'], 1, 1)}
            if 'down_w' in bp:
                pb['down'] = _prep_conv(bp['down_w'], bp['down_bn'], stride, 0)
            blocks_p.append(pb)
        prep['layers'].append(blocks_p)
    nc, nf = params['fc_w'].shape
    Np = _round_up(nc, 128)
    prep['fc'] = {
        'B': jnp.pad(params['fc_w'].T.astype(jnp.bfloat16), ((0, 0), (0, Np - nc))),
        'scale': jnp.pad(jnp.ones((1, nc), jnp.float32), ((0, 0), (0, Np - nc))),
        'bias': jnp.pad(params['fc_b'].reshape(1, nc).astype(jnp.float32),
                        ((0, 0), (0, Np - nc))),
        'oc': nc,
    }
    return prep


if __name__ == "__main__":
    key = jax.random.PRNGKey(0)
    kp, kx = jax.random.split(key)
    params = init_params(kp, num_classes=10)
    prep = prepare_params(params)            # one-time weight layout/padding
    # Small NCHW input (PyTorch convention): batch=2, channels=3, 32x32 spatial.
    x = jax.random.normal(kx, (2, 3, 32, 32), jnp.float32)
    logits = resnet18_forward(prep, x)
    jax.block_until_ready(logits)
    assert logits.shape == (2, 10) and logits.dtype == jnp.float32
    print("KERNEL_OK")
</pallas_src>

<mosaic_0001>
module attributes {stable_mosaic.version = 11 : i64} {
  func.func @_matmul_bn_kernel(%arg0: i32, %arg1: i32, %arg2: memref<128x256xbf16, #tpu.memory_space<vmem>>, %arg3: memref<256x128xbf16, #tpu.memory_space<vmem>>, %arg4: memref<1x128xf32, #tpu.memory_space<vmem>>, %arg5: memref<1x128xf32, #tpu.memory_space<vmem>>, %arg6: memref<128x128xbf16, #tpu.memory_space<vmem>>) attributes {dimension_semantics = [#tpu.dimension_semantics<parallel>, #tpu.dimension_semantics<parallel>], iteration_bounds = array<i64: 4, 1>, scalar_prefetch = 0 : i64, scratch_operands = 0 : i64, tpu.core_type = #tpu.core_type<tc>, window_params = [{transform_indices = @transform_0, window_bounds = array<i64: 128, 256>}, {transform_indices = @transform_1, window_bounds = array<i64: 256, 128>}, {transform_indices = @transform_2, window_bounds = array<i64: 1, 128>}, {transform_indices = @transform_3, window_bounds = array<i64: 1, 128>}, {transform_indices = @transform_4, window_bounds = array<i64: 128, 128>}]} {
    %c0 = arith.constant 0 : index
    %c0_0 = arith.constant 0 : index
    %0 = vector.load %arg2[%c0, %c0_0] : memref<128x256xbf16, #tpu.memory_space<vmem>>, vector<128x256xbf16>
    %c0_1 = arith.constant 0 : index
    %c0_2 = arith.constant 0 : index
    %1 = vector.load %arg3[%c0_1, %c0_2] : memref<256x128xbf16, #tpu.memory_space<vmem>>, vector<256x128xbf16>
    %cst = arith.constant dense<0.000000e+00> : vector<128x128xf32>
    %2 = tpu.matmul %0, %1, %cst {dimension_numbers = #tpu.dot_dimension_numbers<[1], [0], [0], [1], [0, 0, 1, 1], [], []>} : vector<128x256xbf16>, vector<256x128xbf16>, vector<128x128xf32> -> vector<128x128xf32>
    %c0_3 = arith.constant 0 : index
    %c0_4 = arith.constant 0 : index
    %3 = vector.load %arg4[%c0_3, %c0_4] : memref<1x128xf32, #tpu.memory_space<vmem>>, vector<1x128xf32>
    %4 = vector.broadcast %3 : vector<1x128xf32> to vector<128x128xf32>
    %5 = arith.mulf %2, %4 : vector<128x128xf32>
    %c0_5 = arith.constant 0 : index
    %c0_6 = arith.constant 0 : index
    %6 = vector.load %arg5[%c0_5, %c0_6] : memref<1x128xf32, #tpu.memory_space<vmem>>, vector<1x128xf32>
    %7 = vector.broadcast %6 : vector<1x128xf32> to vector<128x128xf32>
    %8 = arith.addf %5, %7 : vector<128x128xf32>
    %cst_7 = arith.constant 0.000000e+00 : f32
    %9 = vector.broadcast %cst_7 : f32 to vector<128x128xf32>
    %10 = arith.maximumf %8, %9 : vector<128x128xf32>
    %11 = arith.truncf %10 : vector<128x128xf32> to vector<128x128xbf16>
    %c0_8 = arith.constant 0 : index
    %c0_9 = arith.constant 0 : index
    %12 = vector.load %arg6[%c0_8, %c0_9] : memref<128x128xbf16, #tpu.memory_space<vmem>>, vector<128x128xbf16>
    tpu.vector_store %arg6[%c0_8, %c0_9], %11 {strides = array<i32>} : memref<128x128xbf16, #tpu.memory_space<vmem>>, vector<128x128xbf16>,
    return
  }
  func.func @transform_0(%arg0: i32, %arg1: i32) -> (i32, i32) {
    %c0_i32 = arith.constant 0 : i32
    %c0_i32_0 = arith.constant 0 : i32
    return %arg0, %c0_i32 : i32, i32
  }
  func.func @transform_1(%arg0: i32, %arg1: i32) -> (i32, i32) {
    %c0_i32 = arith.constant 0 : i32
    %c0_i32_0 = arith.constant 0 : i32
    return %c0_i32, %arg1 : i32, i32
  }
  func.func @transform_2(%arg0: i32, %arg1: i32) -> (i32, i32) {
    %c0_i32 = arith.constant 0 : i32
    %c0_i32_0 = arith.constant 0 : i32
    return %c0_i32, %arg1 : i32, i32
  }
  func.func @transform_3(%arg0: i32, %arg1: i32) -> (i32, i32) {
    %c0_i32 = arith.constant 0 : i32
    %c0_i32_0 = arith.constant 0 : i32
    return %c0_i32, %arg1 : i32, i32
  }
  func.func @transform_4(%arg0: i32, %arg1: i32) -> (i32, i32) {
    %c0_i32 = arith.constant 0 : i32
    return %arg0, %arg1 : i32, i32
  }
}

</mosaic_0001>

<bundles_post_ra>
// kernel: tpu_custom_call.1
= control target key start
LH: loop header
LB: loop body
LE: loop exit
PB: predicated region body
PF: predicated region fallthrough
CT: control target
= control target key end

     0   :  { %9 = vsyncpa [#allocation3], 0  ;;  %s1685_s0 = inlined_call_operand.hbm [shape: bf16[512,256], index: 0, kind: input, shape index: {}]   ;;  %s1686_s1 = inlined_call_operand.hbm [shape: bf16[256,128], index: 1, kind: input, shape index: {}]   ;;  %s1687_s2 = inlined_call_operand.vmem [shape: f32[1,128], index: 2, kind: input, shape index: {}]   ;;  %s1688_s3 = inlined_call_operand.vmem [shape: f32[1,128], index: 3, kind: input, shape index: {}]   ;;  %s1689_s4 = inlined_call_operand.hbm [shape: bf16[512,128], index: 4, kind: output, shape index: {}]  }
   0x1   :  { %11 = vsyncpa [#allocation3 + $0x1], 0 }
   0x2   :  { %12 = vsyncpa [#allocation6], 0 }
   0x3   :  { %13 = vsyncpa [#allocation4], 0 }
   0x4   :  { %15 = vsyncpa [#allocation4 + $0x1], 0  ;;  %s1396_s15 = smov 0   ;;  %s1398_s16 = smov 0  }
   0x5   :  { %s1400_s17 = smov 0   ;;  %s1402_s18 = smov 0  }
   0x6   :  { %s1404_s19 = smov 0   ;;  %s1406_s20 = smov 0  }
   0x7 LB: > { %s881_s21 = sadd.s32 4294967295, %s1360_s20   ;;  %s882_s22 = sadd.s32 4294967294, %s1360_s20   ;;  %s1360_s20 = sphi %s1406_s20, %s21_s20   ;;  %s1356_s19 = sphi %s1404_s19, %s1712_s19   ;;  %s1352_s18 = sphi %s1402_s18, %s1711_s18   ;;  %s1348_s17 = sphi %s1400_s17, %s1710_s17   ;;  %s1344_s16 = sphi %s1398_s16, %s1709_s16   ;;  %s1340_s15 = sphi %s1396_s15, %s1708_s15  }
   0x8   : > { %p53_p0 = scmp.ne.s32.totalorder %s1344_s16, %s1340_s15  ;;  %p1430_p1 = scmp.eq.s32.totalorder %s881_s21, 0 }
   0x9   : > { %p1434_p2 = scmp.eq.s32.totalorder %s881_s21, 3  ;;  %p163_p3 = scmp.eq.s32.totalorder %s882_s22, 3 }
   0xa   : > { %s1694_s23 = scalar_select %p1430_p1, 1, 0 }
   0xb   : > { %s1695_s24 = scalar_select %p1434_p2, 1, 0 }
   0xc   : > { %p1440_p4 = por %p1430_p1, %p53_p0  ;;  %p883_p5 = scmp.ge.s32.totalorder %s1360_s20, 1 }
   0xd   : > { %p1445_p6 = por %p163_p3, %p53_p0  ;;  %p170_p7 = scmp.lt.s32.totalorder %s1360_s20, 5 }
   0xe   : > { %s1696_s25 = scalar_select %p1440_p4, 1, 0 }
   0xf   : > { %s1697_s26 = scalar_select %p1445_p6, 1, 0 }
  0x10   : > { %p1450_p8 = pnand %p883_p5, %p170_p7  ;;  %s1362_s28 = smov [#allocation5]  }
  0x11   : > { %s184_s29 = sshll.u32 %s1362_s28, 4  ;;  %s33_s5 = sadd.s32 1, %s1356_s19  ;;  %s185_s29 = int_to_ptr.vmem [resolvable:$true] %s184_s29 }
  0x12   : > { %s1698_s27 = scalar_select %p1450_p8, 1, 0 }
  0x13   : > { %p1105_p9 = pneg %p1450_p8  ;;  %s1216_s8 = scalar_lea.hbm %s1686_s1, 2048 }
  0x14   : > { %p1217_p11 = scmp.ne.s32.totalorder %s1686_s1, %s1216_s8  ;;  %p1223_p3 = scmp.lt.u32.totalorder %s1216_s8, %s1686_s1 }
  0x15   : > { %p1458_p10 = pnand %p1105_p9, %p1430_p1 }
  0x17   : > { %p1218_p12 = pneg %p1458_p10 }
  0x19   : > { %p1219_p13 = pnand %p1218_p12, %p1217_p11 }
  0x1b   : > { %p1220_p0 = pneg %p1219_p13 }
  0x1d   : > { %p1225_p5 = pnand %p1223_p3, %p1220_p0 }
  0x1f   : > { %1228 = shalt.err (!%p1225_p5)
}
  0x20   : > { %s1229_s13 = scalar_lea.vmem %s185_s29, 2048  ;;  %p1237_p1 = scmp.lt.s32.totalorder %s185_s29, %s185_s29 }
  0x21   : > { %p1230_p7 = scmp.ne.s32.totalorder %s185_s29, %s1229_s13  ;;  %p1238_p4 = scmp.lt.s32.totalorder %s1229_s13, %s1229_s13 }
  0x23   : > { %p1232_p9 = pnand %p1230_p7, %p1218_p12  ;;  %p1239_p8 = por %p1238_p4, %p1237_p1 }
  0x25   : > { %p1233_p6 = pneg %p1232_p9 }
  0x27   : > { %p1240_p2 = pnand %p1239_p8, %p1233_p6 }
  0x29   : > { %1243 = shalt.err (!%p1240_p2)
}
  0x2a   : > { %s1363_s14 = smov 64   ;;  %s1364_s21 = smov 4  }
  0x2b   : > { %1108 = dma.hbm_to_vmem [thread:$0]  (!%p1458_p10), %s1686_s1, 2048, %s185_s29, [#allocation6], %s1363_s14, %s1363_s14, %s1364_s21  }
  0x2c   : > { %p35_p1 = scmp.ge.s32.totalorder %s33_s5, 4  ;;  %s40_s6 = sadd.s32 1, %s1348_s17 }
  0x2d   : > { %p47_p2 = scmp.ne.s32.totalorder %s1348_s17, %s1344_s16  ;;  %p48_p4 = scmp.eq.s32.totalorder %s1360_s20, 0 }
  0x2e   : > { %s1714_s5 = smov (%p35_p1, %s33_s5), 0  ;;  %p1701_p8 = scmp.ne.s32.totalorder %s1695_s24, 0 }
  0x2f   : > { %p1485_p6 = por %p48_p4, %p47_p2  ;;  %s37_s30 = ssub.s32 %s1356_s19, %s1714_s5 }
  0x30   : > { %p1491_p11 = por %p1701_p8, %p47_p2  ;;  %p1118_p12 = scmp.lt.s32.totalorder %s1360_s20, 4 }
  0x31   : > { %p38_p10 = scmp.eq.s32.totalorder %s37_s30, 0  ;;  %s210_s29 = sand.u32 1, %s1348_s17  }
  0x32   : > { %s888_s9 = sshll.u32 %s210_s29, 7  ;;  %s952_s11 = sshll.u32 %s1356_s19, 11 }
  0x33   : > { %s1500_s10 = scalar_select %p38_p10, %s1348_s17, %s40_s6  }
  0x34   : > { %s1506_s14 = scalar_lea.hbm %s1685_s0, %s952_s11  ;;  %s214_s24 = scalar_lea.vmem [#allocation2], %s888_s9 }
  0x35   : > { %s222_s21 = sshll.u32 %s214_s24, 4  ;;  %p1512_p13 = pnand %p1118_p12, %p1485_p6  ;;  %s1508_s21 = int_to_ptr.vmem [resolvable:$true] %s222_s21 }
  0x36   : > { %s1516_s28 = scalar_lea.sflag [#allocation3], %s210_s29  ;;  %s1244_s6 = scalar_lea.hbm %s1506_s14, 2048 }
  0x37   : > { %p1245_p0 = scmp.ne.s32.totalorder %s1506_s14, %s1244_s6  ;;  %p1246_p3 = pneg %p1512_p13 }
  0x38   : > { %s1249_s7 = scalar_lea.hbm %s1685_s0, 8192  ;;  %p1250_p9 = scmp.lt.u32.totalorder %s1506_s14, %s1685_s0 }
  0x39   : > { %p1247_p5 = pnand %p1246_p3, %p1245_p0  ;;  %p1251_p1 = scmp.lt.u32.totalorder %s1249_s7, %s1244_s6 }
  0x3a   : > { %p1253_p4 = scmp.lt.u32.totalorder %s1244_s6, %s1506_s14 }
  0x3b   : > { %p1248_p7 = pneg %p1247_p5  ;;  %p1252_p2 = por %p1251_p1, %p1250_p9 }
  0x3d   : > { %p1254_p6 = por %p1253_p4, %p1252_p2 }
  0x3f   : > { %p1255_p8 = pnand %p1254_p6, %p1248_p7 }
  0x41   : > { %1258 = shalt.err (!%p1255_p8)
}
  0x42   : > { %s1259_s29 = scalar_lea.vmem %s1508_s21, 2048  ;;  %s1365_s13 = smov [#allocation2]  }
  0x43   : > { %p1260_p12 = scmp.ne.s32.totalorder %s1508_s21, %s1259_s29  ;;  %s1264_s24 = sshll.u32 %s1365_s13, 4  ;;  %s1265_s24 = int_to_ptr.vmem [resolvable:$false] %s1264_s24 }
  0x44   : > { %s1266_s30 = scalar_lea.vmem %s1265_s24, 4096  ;;  %p1267_p5 = scmp.lt.s32.totalorder %s1508_s21, %s1265_s24 }
  0x45   : > { %p1262_p10 = pnand %p1260_p12, %p1246_p3  ;;  %p1268_p9 = scmp.lt.s32.totalorder %s1266_s30, %s1259_s29 }
  0x47   : > { %p1263_p0 = pneg %p1262_p10  ;;  %p1269_p1 = por %p1268_p9, %p1267_p5 }
  0x49   : > { %p1270_p2 = pnand %p1269_p1, %p1263_p0 }
  0x4b   : > { %1273 = shalt.err (!%p1270_p2)
}
  0x4c   : > { %s1366_s6 = smov 128   ;;  %s1367_s9 = smov 8  }
  0x4d   : > { %1112 = dma.hbm_to_vmem [thread:$0]  (!%p1512_p13), %s1506_s14, 2048, %s1508_s21, %s1516_s28, %s1366_s6, %s1366_s6, %s1367_s9  }
  0x4e   : > { %p1704_p3 = scmp.ne.s32.totalorder %s1698_s27, 0 }
  0x4f   : > { %s1547_s7 = sand.u32 (!%p1704_p3), 1, %s1344_s16   ;;  %p1705_p7 = scmp.ne.s32.totalorder (!%p1704_p3), %s1696_s25, 0 }
  0x50   : > { %234 = sbr.rel (%p1704_p3) target bundleno = 389 (0x185), region = 36  ;;  %s893_s11 = sshll.u32 (!%p1704_p3), %s1547_s7, 7 }
  0x51   : > { %s237_s12 = scalar_lea.sflag (!%p1704_p3), [#allocation3], %s1547_s7  ;;  %s1551_s29 = scalar_lea.vmem (!%p1704_p3), [#allocation2], %s893_s11 }
  0x57   : > { %1327 = dma.done.wait (%p1705_p7), %s237_s12, 2048  }
  0x58   : > { %1329 = vsyncadd (%p1705_p7), %s237_s12, 4294965248  ;;  %p1706_p13 = scmp.ne.s32.totalorder %s1694_s23, 0 }
  0x5a   : > { %1331 = dma.done.wait (%p1706_p13), [#allocation6], 2048  }
  0x5b   : > { %1333 = vsyncadd (%p1706_p13), [#allocation6], 4294965248  ;;  %v1176_v0 = vld [vmem:[#allocation5 + $0x40] sm:$0xff]   ;;  %v1178_v2 = vld [vmem:[#allocation5 + $0x48] sm:$0xff]   ;;  %s895_s21 = sshll.u32 %s1547_s7, 6  ;;  %s969_s28 = sshll.u32 %s1352_s18, 10 }
  0x5c   : > { %v1177_v1 = vld [vmem:[#allocation5] sm:$0xff]   ;;  %1017 = vmatprep.subr.bf16.mxu0 %v1176_v0  ;;  %1081 = vmatprep.subr.bf16.mxu1 %v1176_v0  ;;  %v1179_v3 = vld [vmem:[#allocation5 + $0x8] sm:$0xff]   ;;  %v1180_v4 = vld [vmem:[#allocation5 + $0x50] sm:$0xff]   ;;  %s1598_s22 = scalar_lea.vmem [#allocation7], %s895_s21  ;;  %s1633_s6 = scalar_lea.hbm %s1689_s4, %s969_s28 }
  0x5d   : > { %1018 = vmatpush3.bf16.msra.mxu0 %v1177_v1  ;;  %1089 = vmatpush3.bf16.msra.mxu1 %v1177_v1  ;;  %v1181_v5 = vld [vmem:[#allocation5 + $0x10] sm:$0xff]   ;;  %v1182_v6 = vld [vmem:[#allocation5 + $0x58] sm:$0xff]   ;;  %v1184_v8 = vld [vmem:[#allocation5 + $0x60] sm:$0xff]   ;;  %s762_s13 = sshll.u32 %s1598_s22, 4  ;;  %s748_s18 = scalar_lea.sflag [#allocation4], %s1547_s7  ;;  %s1635_s13 = int_to_ptr.vmem [resolvable:$true] %s762_s13 }
  0x5e   : > { %1019 = vmatprep.subr.bf16.mxu0 %v1178_v2  ;;  %1082 = vmatprep.subr.bf16.mxu1 %v1178_v2  ;;  %v1183_v7 = vld [vmem:[#allocation5 + $0x18] sm:$0xff]   ;;  %v1185_v9 = vld [vmem:[#allocation5 + $0x20] sm:$0xff]   ;;  %v1186_v10 = vld [vmem:[#allocation5 + $0x68] sm:$0xff]   ;;  %s1274_s9 = scalar_lea.vmem %s1635_s13, 1024  ;;  %s1368_s11 = smov [#allocation7]  }
  0x5f   : > { %v1194_v11 = vld [vmem:[%s1551_s29 + $0x4] ss:$8 sps:$4 sm:$0xff]   ;;  %v1188_v14 = vld [vmem:[#allocation5 + $0x70] sm:$0xff]   ;;  %v1190_v16 = vld [vmem:[#allocation5 + $0x78] sm:$0xff]   ;;  %p1275_p4 = scmp.ne.s32.totalorder %s1635_s13, %s1274_s9  ;;  %s1278_s12 = sshll.u32 %s1368_s11, 4  ;;  %s1279_s12 = int_to_ptr.vmem [resolvable:$false] %s1278_s12 }
  0x60   : > { %v1197_v12 = vld [vmem:[%s1551_s29 + $0x44] ss:$8 sps:$4 sm:$0xff]   ;;  %540 = vmatprep.mubr.bf16.mxu0 %v1194_v11  ;;  %v1189_v15 = vld [vmem:[#allocation5 + $0x30] sm:$0xff]   ;;  %v1191_v17 = vld [vmem:[#allocation5 + $0x38] sm:$0xff]   ;;  %p1281_p12 = scmp.lt.s32.totalorder %s1635_s13, %s1279_s12 }
  0x61   : > { %1020 = vmatpush3.bf16.msra.mxu0 %v1179_v3  ;;  %1090 = vmatpush3.bf16.msra.mxu1 %v1179_v3  ;;  %v1187_v13 = vld [vmem:[#allocation5 + $0x28] sm:$0xff]   ;;  %v1198_v20 = vld [vmem:[%s1551_s29 + $0x14] ss:$8 sps:$4 sm:$0xff]   ;;  %v1202_v22 = vld [vmem:[%s1551_s29 + $0x10] ss:$8 sps:$4 sm:$0xff]   ;;  %p1276_p6 = pnand %p1275_p4, %p1491_p11 }
  0x62   : > { %1021 = vmatprep.subr.bf16.mxu0 %v1180_v4  ;;  %1083 = vmatprep.subr.bf16.mxu1 %v1180_v4  ;;  %v1192_v18 = vld [vmem:[%s1551_s29] ss:$8 sps:$4 sm:$0xff]   ;;  %v1200_v21 = vld [vmem:[%s1551_s29 + $0x54] ss:$8 sps:$4 sm:$0xff]   ;;  %v1203_v23 = vld [vmem:[%s1551_s29 + $0x50] ss:$8 sps:$4 sm:$0xff]  }
  0x63   : > { %572 = vmatprep.mubr.bf16.mxu1 %v1197_v12  ;;  %v1195_v19 = vld [vmem:[%s1551_s29 + $0x40] ss:$8 sps:$4 sm:$0xff]   ;;  %v1204_v24 = vld [vmem:[%s1551_s29 + $0x24] ss:$8 sps:$4 sm:$0xff]   ;;  %v1210_v28 = vld [vmem:[%s1551_s29 + $0x34] ss:$8 sps:$4 sm:$0xff]   ;;  %p1277_p8 = pneg %p1276_p6 }
  0x64   : > { %v1206_v25 = vld [vmem:[%s1551_s29 + $0x64] ss:$8 sps:$4 sm:$0xff]   ;;  %v1208_v26 = vld [vmem:[%s1551_s29 + $0x20] ss:$8 sps:$4 sm:$0xff]   ;;  %v1212_v29 = vld [vmem:[%s1551_s29 + $0x74] ss:$8 sps:$4 sm:$0xff]  }
  0x65   : > { %1022 = vmatpush3.bf16.msra.mxu0 %v1181_v5  ;;  %1091 = vmatpush3.bf16.msra.mxu1 %v1181_v5  ;;  %v1209_v27 = vld [vmem:[%s1551_s29 + $0x60] ss:$8 sps:$4 sm:$0xff]   ;;  %v1214_v30 = vld [vmem:[%s1551_s29 + $0x30] ss:$8 sps:$4 sm:$0xff]  }
  0x66   : > { %1023 = vmatprep.subr.bf16.mxu0 %v1182_v6  ;;  %1084 = vmatprep.subr.bf16.mxu1 %v1182_v6  ;;  %v1215_v31 = vld [vmem:[%s1551_s29 + $0x70] ss:$8 sps:$4 sm:$0xff]   ;;  %v1580_v35 = vld [vmem:[%s1687_s2] ss:$0 sm:$0xff]  ;;  %s1280_s29 = scalar_lea.vmem %s1279_s12, 2048 }
  0x67   : > { %v1585_v41 = vld [vmem:[%s1688_s3] ss:$0 sm:$0xff]  ;;  %p1282_p10 = scmp.lt.s32.totalorder %s1280_s29, %s1274_s9 }
  0x69   : > { %1024 = vmatpush3.bf16.msra.mxu0 %v1183_v7  ;;  %1092 = vmatpush3.bf16.msra.mxu1 %v1183_v7  ;;  %p1283_p0 = por %p1282_p10, %p1281_p12 }
  0x6a   : > { %1025 = vmatprep.subr.bf16.mxu0 %v1184_v8  ;;  %1085 = vmatprep.subr.bf16.mxu1 %v1184_v8 }
  0x6b   : > { %p1284_p5 = pnand %p1283_p0, %p1277_p8 }
  0x6d   : > { %1026 = vmatpush3.bf16.msra.mxu0 %v1185_v9  ;;  %1093 = vmatpush3.bf16.msra.mxu1 %v1185_v9 }
  0x6e   : > { %1027 = vmatprep.subr.bf16.mxu0 %v1186_v10  ;;  %1086 = vmatprep.subr.bf16.mxu1 %v1186_v10 }
  0x71   : > { %1028 = vmatpush3.bf16.msra.mxu0 %v1187_v13  ;;  %1094 = vmatpush3.bf16.msra.mxu1 %v1187_v13 }
  0x72   : > { %1029 = vmatprep.subr.bf16.mxu0 %v1188_v14  ;;  %1087 = vmatprep.subr.bf16.mxu1 %v1188_v14 }
  0x75   : > { %1030 = vmatpush3.bf16.msra.mxu0 %v1189_v15  ;;  %1095 = vmatpush3.bf16.msra.mxu1 %v1189_v15 }
  0x76   : > { %1031 = vmatprep.subr.bf16.mxu0 %v1190_v16  ;;  %1088 = vmatprep.subr.bf16.mxu1 %v1190_v16 }
  0x79   : > { %1032 = vmatpush3.bf16.msra.mxu0 %v1191_v17  ;;  %1096 = vmatpush3.bf16.msra.mxu1 %v1191_v17 }
  0x7c   : > { %541 = vmatmul.mubr.bf16.vlgmr.msra.gmra.mrb[0].mxu0 %v1192_v18  ;;  %573 = vmatmul.mubr.bf16.vlgmr.msra.gmra.mrb[0].mxu1 %v1195_v19 }
  0x7d   : > { %548 = vmatprep.mubr.bf16.mxu0 %v1198_v20  ;;  %580 = vmatprep.mubr.bf16.mxu1 %v1200_v21 }
  0x84   : > { %549 = vmatmul.mubr.bf16.gmra.mrb[4].mxu0 %v1202_v22  ;;  %581 = vmatmul.mubr.bf16.gmra.mrb[4].mxu1 %v1203_v23 }
  0x85   : > { %556 = vmatprep.mubr.bf16.mxu0 %v1204_v24  ;;  %588 = vmatprep.mubr.bf16.mxu1 %v1206_v25 }
  0x8c   : > { %557 = vmatmul.mubr.bf16.gmra.mrb[8].mxu0 %v1208_v26  ;;  %589 = vmatmul.mubr.bf16.gmra.mrb[8].mxu1 %v1209_v27 }
  0x8d   : > { %564 = vmatprep.mubr.bf16.mxu0 %v1210_v28  ;;  %596 = vmatprep.mubr.bf16.mxu1 %v1212_v29 }
  0x94   : > { %565 = vmatmul.mubr.bf16.gmra.mrb[12].mxu0 %v1214_v30  ;;  %597 = vmatmul.mubr.bf16.gmra.mrb[12].mxu1 %v1215_v31 }
 0x14f   : > { %v1033_v32 = vpop.f32.mrb[0].mxu0  ;;  %v1057_v33 = vpop.f32.mrb[0].mxu1 }
 0x150   : > { %v1034_v34 = vpop.f32.mrb[1].mxu0  ;;  %v1058_v36 = vpop.f32.mrb[1].mxu1 }
 0x151   : > { %v1035_v37 = vadd.f32 %v1034_v34, %v1033_v32  ;;  %v1059_v38 = vadd.f32 %v1058_v36, %v1057_v33  ;;  %v1036_v39 = vpop.f32.mrb[2].mxu0  ;;  %v1060_v40 = vpop.f32.mrb[2].mxu1 }
 0x152   : > { %v1037_v42 = vpop.f32.mrb[3].mxu0  ;;  %v1061_v43 = vpop.f32.mrb[3].mxu1 }
 0x153   : > { %v612_v44 = vmul.f32 %v1035_v37, %v1580_v35  ;;  %v620_v45 = vmul.f32 %v1059_v38, %v1580_v35  ;;  %v1038_v46 = vadd.f32 %v1037_v42, %v1036_v39  ;;  %v1062_v47 = vadd.f32 %v1061_v43, %v1060_v40 }
 0x155   : > { %v635_v48 = vadd.f32 %v1585_v41, %v612_v44  ;;  %v643_v49 = vadd.f32 %v1585_v41, %v620_v45  ;;  %v613_v50 = vmul.f32 %v1038_v46, %v1580_v35  ;;  %v621_v51 = vmul.f32 %v1062_v47, %v1580_v35 }
 0x157   : > { %v636_v52 = vadd.f32 %v1585_v41, %v613_v50  ;;  %v644_v53 = vadd.f32 %v1585_v41, %v621_v51  ;;  %v1039_v54 = vpop.f32.mrb[4].mxu0  ;;  %v1063_v55 = vpop.f32.mrb[4].mxu1  ;;  %v651_v56 = vmax.f32 %v635_v48, 0.0  ;;  %v659_v57 = vmax.f32 %v643_v49, 0.0 }
 0x158   : > { %v1040_v58 = vpop.f32.mrb[5].mxu0  ;;  %v1064_v59 = vpop.f32.mrb[5].mxu1 }
 0x159   : > { %v652_v60 = vmax.f32 %v636_v52, 0.0  ;;  %v660_v61 = vmax.f32 %v644_v53, 0.0  ;;  %v1041_v62 = vadd.f32 %v1040_v58, %v1039_v54  ;;  %v1065_v63 = vadd.f32 %v1064_v59, %v1063_v55  ;;  %v1042_v0 = vpop.f32.mrb[6].mxu0  ;;  %v1066_v1 = vpop.f32.mrb[6].mxu1 }
 0x15a   : > { %v1043_v2 = vpop.f32.mrb[7].mxu0  ;;  %v1067_v3 = vpop.f32.mrb[7].mxu1 }
 0x15b   : > { %v973_v4 = vpack.c.bf16 %v652_v60, %v651_v56  ;;  %v993_v5 = vpack.c.bf16 %v660_v61, %v659_v57  ;;  %v614_v6 = vmul.f32 %v1041_v62, %v1580_v35  ;;  %v622_v7 = vmul.f32 %v1065_v63, %v1580_v35 }
 0x15c   : > { %v1044_v8 = vadd.f32 %v1043_v2, %v1042_v0  ;;  %v1068_v9 = vadd.f32 %v1067_v3, %v1066_v1 }
 0x15d   : > { %974 = vst [vmem:[%s1598_s22] sm:$0xff] %v973_v4   ;;  %1013 = vst [vmem:[%s1598_s22 + $0x20] sm:$0xff] %v993_v5   ;;  %v637_v10 = vadd.f32 %v1585_v41, %v614_v6  ;;  %v645_v11 = vadd.f32 %v1585_v41, %v622_v7 }
 0x15e   : > { %v615_v12 = vmul.f32 %v1044_v8, %v1580_v35  ;;  %v623_v13 = vmul.f32 %v1068_v9, %v1580_v35 }
 0x15f   : > { %v1045_v14 = vpop.f32.mrb[8].mxu0  ;;  %v1069_v15 = vpop.f32.mrb[8].mxu1  ;;  %v653_v24 = vmax.f32 %v637_v10, 0.0  ;;  %v661_v25 = vmax.f32 %v645_v11, 0.0 }
 0x160   : > { %v638_v16 = vadd.f32 %v1585_v41, %v615_v12  ;;  %v646_v17 = vadd.f32 %v1585_v41, %v623_v13  ;;  %v1046_v18 = vpop.f32.mrb[9].mxu0  ;;  %v1070_v19 = vpop.f32.mrb[9].mxu1 }
 0x161   : > { %v1047_v20 = vadd.f32 %v1046_v18, %v1045_v14  ;;  %v1071_v21 = vadd.f32 %v1070_v19, %v1069_v15  ;;  %v1048_v22 = vpop.f32.mrb[10].mxu0  ;;  %v1072_v23 = vpop.f32.mrb[10].mxu1 }
 0x162   : > { %v654_v26 = vmax.f32 %v638_v16, 0.0  ;;  %v662_v27 = vmax.f32 %v646_v17, 0.0  ;;  %v1049_v28 = vpop.f32.mrb[11].mxu0  ;;  %v1073_v29 = vpop.f32.mrb[11].mxu1 }
 0x163   : > { %v616_v30 = vmul.f32 %v1047_v20, %v1580_v35  ;;  %v624_v31 = vmul.f32 %v1071_v21, %v1580_v35  ;;  %v1050_v32 = vadd.f32 %v1049_v28, %v1048_v22  ;;  %v1074_v33 = vadd.f32 %v1073_v29, %v1072_v23 }
 0x164   : > { %v978_v34 = vpack.c.bf16 %v654_v26, %v653_v24  ;;  %v998_v36 = vpack.c.bf16 %v662_v27, %v661_v25 }
 0x165   : > { %v639_v37 = vadd.f32 %v1585_v41, %v616_v30  ;;  %v647_v38 = vadd.f32 %v1585_v41, %v624_v31  ;;  %v617_v39 = vmul.f32 %v1050_v32, %v1580_v35  ;;  %v625_v40 = vmul.f32 %v1074_v33, %v1580_v35 }
 0x166   : > { %1010 = vst [vmem:[%s1598_s22 + $0x8] sm:$0xff] %v978_v34   ;;  %1014 = vst [vmem:[%s1598_s22 + $0x28] sm:$0xff] %v998_v36  }
 0x167   : > { %v640_v42 = vadd.f32 %v1585_v41, %v617_v39  ;;  %v648_v43 = vadd.f32 %v1585_v41, %v625_v40  ;;  %v1051_v44 = vpop.f32.mrb[12].mxu0  ;;  %v1075_v45 = vpop.f32.mrb[12].mxu1  ;;  %v655_v46 = vmax.f32 %v639_v37, 0.0  ;;  %v663_v47 = vmax.f32 %v647_v38, 0.0 }
 0x168   : > { %v1052_v48 = vpop.f32.mrb[13].mxu0  ;;  %v1076_v49 = vpop.f32.mrb[13].mxu1 }
 0x169   : > { %v656_v50 = vmax.f32 %v640_v42, 0.0  ;;  %v664_v51 = vmax.f32 %v648_v43, 0.0  ;;  %v1053_v52 = vadd.f32 %v1052_v48, %v1051_v44  ;;  %v1077_v53 = vadd.f32 %v1076_v49, %v1075_v45  ;;  %v1054_v54 = vpop.f32.mrb[14].mxu0  ;;  %v1078_v55 = vpop.f32.mrb[14].mxu1 }
 0x16a   : > { %v1055_v56 = vpop.f32.mrb[15].mxu0  ;;  %v1079_v57 = vpop.f32.mrb[15].mxu1 }
 0x16b   : > { %v983_v58 = vpack.c.bf16 %v656_v50, %v655_v46  ;;  %v1003_v59 = vpack.c.bf16 %v664_v51, %v663_v47  ;;  %v618_v60 = vmul.f32 %v1053_v52, %v1580_v35  ;;  %v626_v61 = vmul.f32 %v1077_v53, %v1580_v35 }
 0x16c   : > { %v1056_v62 = vadd.f32 %v1055_v56, %v1054_v54  ;;  %v1080_v63 = vadd.f32 %v1079_v57, %v1078_v55 }
 0x16d   : > { %1011 = vst [vmem:[%s1598_s22 + $0x10] sm:$0xff] %v983_v58   ;;  %1015 = vst [vmem:[%s1598_s22 + $0x30] sm:$0xff] %v1003_v59   ;;  %v641_v0 = vadd.f32 %v1585_v41, %v618_v60  ;;  %v649_v1 = vadd.f32 %v1585_v41, %v626_v61 }
 0x16e   : > { %v619_v2 = vmul.f32 %v1056_v62, %v1580_v35  ;;  %v627_v3 = vmul.f32 %v1080_v63, %v1580_v35 }
 0x16f   : > { %v657_v6 = vmax.f32 %v641_v0, 0.0  ;;  %v665_v7 = vmax.f32 %v649_v1, 0.0 }
 0x170   : > { %v642_v4 = vadd.f32 %v1585_v41, %v619_v2  ;;  %v650_v5 = vadd.f32 %v1585_v41, %v627_v3 }
 0x172   : > { %v658_v8 = vmax.f32 %v642_v4, 0.0  ;;  %v666_v9 = vmax.f32 %v650_v5, 0.0 }
 0x174   : > { %v988_v35 = vpack.c.bf16 %v658_v8, %v657_v6  ;;  %v1008_v10 = vpack.c.bf16 %v666_v9, %v665_v7 }
 0x176   : > { %1012 = vst [vmem:[%s1598_s22 + $0x18] sm:$0xff] %v988_v35   ;;  %1016 = vst [vmem:[%s1598_s22 + $0x38] sm:$0xff] %v1008_v10  }
 0x177   : > { %1287 = shalt.err (!%p1284_p5)
}
 0x178   : > { %s1288_s23 = scalar_lea.hbm %s1633_s6, 1024  ;;  %s1292_s14 = scalar_lea.hbm %s1689_s4, 4096 }
 0x179   : > { %p1289_p9 = scmp.ne.s32.totalorder %s1633_s6, %s1288_s23  ;;  %p1293_p3 = scmp.lt.u32.totalorder %s1633_s6, %s1689_s4 }
 0x17a   : > { %p1294_p7 = scmp.lt.u32.totalorder %s1292_s14, %s1288_s23  ;;  %p1296_p4 = scmp.lt.u32.totalorder %s1288_s23, %s1633_s6 }
 0x17b   : > { %p1290_p1 = pnand %p1289_p9, %p1491_p11 }
 0x17c   : > { %p1295_p13 = por %p1294_p7, %p1293_p3 }
 0x17d   : > { %p1291_p2 = pneg %p1290_p1 }
 0x17e   : > { %p1297_p6 = por %p1296_p4, %p1295_p13 }
 0x180   : > { %p1298_p8 = pnand %p1297_p6, %p1291_p2 }
 0x182   : > { %1301 = shalt.err (!%p1298_p8)
}
 0x183   : > { %s1369_s28 = smov 64   ;;  %s1370_s24 = smov 4  }
 0x184   : > { %1103 = dma.vmem_to_hbm [thread:$0]  (%p1491_p11), %s1635_s13, 1024, %s1633_s6, %s748_s18, %s1369_s28, %s1369_s28, %s1370_s24  }
 0x185 PF: > { %p1120_p12 = scmp.ge.s32.totalorder %s1360_s20, 2  ;;  %s777_s30 = sand.u32 1, %s1340_s15  }
 0x186   : > { %p1707_p10 = scmp.ne.s32.totalorder %s1697_s26, 0  ;;  %s778_s9 = scalar_lea.sflag [#allocation4], %s777_s30 }
 0x188   : > { %p1114_p0 = pnand %p1120_p12, %p1707_p10 }
 0x18a   : > { %1335 = dma.done.wait (!%p1114_p0), %s778_s9, 1024  }
 0x18b   : > { %1337 = vsyncadd (!%p1114_p0), %s778_s9, 4294966272  ;;  %s21_s20 = sadd.s32 1, %s1360_s20   ;;  %s1708_s15 = smov %s1344_s16 }
 0x18c   : > { %p18_p5 = scmp.ge.s32.totalorder %s21_s20, 6   ;;  %s1709_s16 = smov %s1348_s17 }
 0x18d   : > { %s1710_s17 = smov %s1500_s10  ;;  %s1711_s18 = smov %s1356_s19 }
 0x18e   : > { %s1712_s19 = smov %s1714_s5  ;;  %20 = sbr.rel (!%p18_p5) target bundleno = 7 (0x7), region = 92 }
 0x195   :  { %783 = vsyncpa [#allocation3], 1 }
 0x196   :  { %785 = vsyncpa [#allocation3 + $0x1], 1 }
 0x197   :  { %786 = vsyncpa [#allocation6], 1 }
 0x198   :  { %787 = vsyncpa [#allocation4], 1 }
 0x199   :  { %789 = vsyncpa [#allocation4 + $0x1], 1 }

</bundles_post_ra>
